<compile_context>
chip_gen: v6e
topology: v6e:2x2x1
jax: 0.10.0
libtpu: 0.0.40
codegen_flags: <defaults>
</compile_context>

<pallas_src>
import functools
import math

import jax
import jax.numpy as jnp
from jax.experimental import pallas as pl
from jax.experimental.pallas import tpu as pltpu

_NEG_INF = -1e30  # finite stand-in for -inf: exp(_NEG_INF - m) underflows to 0


def _contrastive_kernel(q_ref, k_ref, out_ref, m_ref, l_ref, pos_ref,
                        *, n_valid, has_pad, tile_m, tile_n):
    i = pl.program_id(0)          # row tile      (parallel)
    j = pl.program_id(1)          # column tile   (streamed / arbitrary)
    last_j = pl.num_programs(1) - 1

    # ---- per-row-tile init: reset online-LSE state ----
    @pl.when(j == 0)
    def _():
        m_ref[...] = jnp.full_like(m_ref, _NEG_INF)
        l_ref[...] = jnp.zeros_like(l_ref)
        pos_ref[...] = jnp.zeros_like(pos_ref)

    # ---- similarity block on the MXU (1/temperature already folded into operands) ----
    s = jax.lax.dot_general(q_ref[...], k_ref[...], (((1,), (1,)), ((), ())),
                            preferred_element_type=jnp.float32)   # (tile_m, tile_n)

    def lse_update(x):
        m_prev = m_ref[...]
        m_new = jnp.maximum(m_prev, jnp.max(x, axis=-1, keepdims=True))
        alpha = jnp.exp(m_prev - m_new)
        l_ref[...] = alpha * l_ref[...] + jnp.sum(jnp.exp(x - m_new), axis=-1, keepdims=True)
        m_ref[...] = m_new

    # Does this (i, j) tile intersect the diagonal?  (handles tile_m != tile_n)
    diag_tile = jnp.logical_and(j * tile_n < (i + 1) * tile_m,
                                (j + 1) * tile_n > i * tile_m)
    if has_pad:
        needs_mask = jnp.logical_or(diag_tile, j == last_j)
    else:
        needs_mask = diag_tile

    # ---- rare path: tile touches the diagonal and/or the padded tail columns ----
    @pl.when(needs_mask)
    def _():
        row_ids = i * tile_m + jax.lax.broadcasted_iota(jnp.int32, s.shape, 0)
        col_ids = j * tile_n + jax.lax.broadcasted_iota(jnp.int32, s.shape, 1)
        diag = row_ids == col_ids
        # positives: diagonal entries (accumulate; a row's diagonal lives in exactly
        # one column tile, padded rows' contributions are zeroed at finalize)
        pos_ref[...] += jnp.sum(jnp.where(diag, s, 0.0), axis=-1, keepdims=True)
        mask = jnp.logical_or(diag, col_ids >= n_valid) if has_pad else diag
        lse_update(jnp.where(mask, _NEG_INF, s))

    # ---- common path: plain online logsumexp, no iota/compare/select ----
    @pl.when(jnp.logical_not(needs_mask))
    def _():
        lse_update(s)

    # ---- finalize on the last column tile: per-row |lse - pos| ----
    @pl.when(j == last_j)
    def _():
        lse = m_ref[...] + jnp.log(l_ref[...])          # (tile_m, 1)
        loss = jnp.abs(lse - pos_ref[...])
        if has_pad:
            rid = i * tile_m + jax.lax.broadcasted_iota(jnp.int32, loss.shape, 0)
            loss = jnp.where(rid < n_valid, loss, 0.0)
        out_ref[...] = loss


def _round_up(x, m):
    return ((x + m - 1) // m) * m


def simple_contrastive_loss(embeddings, temperature=0.1, *, tile_m=256, tile_n=256):
    """Pallas equivalent of SimpleContrastiveLoss.forward (mean over per-row losses)."""
    n, d = embeddings.shape
    inv_temp = 1.0 / float(temperature)

    # ---- one-time normalization + temperature folding (single N*d pass in XLA) ----
    e = embeddings.astype(jnp.float32)
    norm = jnp.sqrt(jnp.sum(e * e, axis=1, keepdims=True))
    e_n = e / jnp.maximum(norm, 1e-12)                      # F.normalize(p=2, dim=1)
    e_n = e_n * jnp.float32(inv_temp ** 0.5)                # fold 1/T into both operands

    # bf16 inputs: keep bf16 matmul operands (f32 accumulation) for MXU rate / DMA bytes.
    op_dtype = jnp.bfloat16 if embeddings.dtype == jnp.bfloat16 else jnp.float32
    e_n = e_n.astype(op_dtype)

    # sublane packing: 8 rows/vreg for f32, 16 for bf16
    sub = 16 if op_dtype == jnp.bfloat16 else 8
    n_sub = _round_up(n, sub)
    tile_m = max(sub, (min(tile_m, n_sub) // sub) * sub)
    tile_n = max(sub, (min(tile_n, n_sub) // sub) * sub)

    n_pad = _round_up(n, math.lcm(tile_m, tile_n))
    if n_pad != n:
        e_n = jnp.pad(e_n, ((0, n_pad - n), (0, 0)))        # padded rows are zero vectors
    grid = (n_pad // tile_m, n_pad // tile_n)

    kernel = functools.partial(
        _contrastive_kernel,
        n_valid=n, has_pad=(n_pad != n), tile_m=tile_m, tile_n=tile_n)

    per_row = pl.pallas_call(
        kernel,
        out_shape=jax.ShapeDtypeStruct((n_pad, 1), jnp.float32),
        grid_spec=pltpu.PrefetchScalarGridSpec(
            num_scalar_prefetch=0,
            grid=grid,
            in_specs=[
                pl.BlockSpec((tile_m, d), lambda i, j: (i, 0)),   # query rows (resident per i)
                pl.BlockSpec((tile_n, d), lambda i, j: (j, 0)),   # key rows (streamed over j)
            ],
            out_specs=pl.BlockSpec((tile_m, 1), lambda i, j: (i, 0)),
            scratch_shapes=[
                pltpu.VMEM((tile_m, 1), jnp.float32),   # running max
                pltpu.VMEM((tile_m, 1), jnp.float32),   # running sum-exp
                pltpu.VMEM((tile_m, 1), jnp.float32),   # positives (diagonal)
            ],
        ),
        compiler_params=pltpu.CompilerParams(
            dimension_semantics=("parallel", "arbitrary"),
            # Actual usage at default tiles is far below this; re-derive for very
            # large d / tile combos on v7x (64 MiB physical VMEM).
            vmem_limit_bytes=64 * 1024 * 1024,
        ),
    )(e_n, e_n)

    # mean over all rows (padded rows were zeroed inside the kernel)
    return jnp.sum(per_row) / n


def _reference_loss(embeddings, temperature=0.1):
    e = embeddings.astype(jnp.float32)
    e = e / jnp.maximum(jnp.linalg.norm(e, axis=1, keepdims=True), 1e-12)
    sim = jnp.matmul(e, e.T, precision=jax.lax.Precision.HIGHEST) / temperature
    pos = jnp.diagonal(sim)
    mask = jnp.eye(sim.shape[0], dtype=bool)
    neg = jnp.where(mask, -jnp.inf, sim)
    neg = jax.scipy.special.logsumexp(neg, axis=1)
    return jnp.mean(jnp.abs(neg - pos))


if __name__ == "__main__":
    TEMPERATURE = 0.1
    key = jax.random.PRNGKey(0)

    # Case 1: multi-tile online-LSE path, no padding (grid 2 x 2).
    emb1 = jax.random.normal(key, (16, 32), dtype=jnp.float32)
    loss1 = jax.block_until_ready(
        simple_contrastive_loss(emb1, temperature=TEMPERATURE, tile_m=8, tile_n=8))
    ref1 = jax.block_until_ready(_reference_loss(emb1, TEMPERATURE))
    assert jnp.allclose(loss1, ref1, rtol=1e-3, atol=1e-3), (loss1, ref1)

    # Case 2: padded tail + decoupled tiles (n=20 -> n_pad=32, tile_m=8, tile_n=16).
    emb2 = jax.random.normal(jax.random.PRNGKey(1), (20, 32), dtype=jnp.float32)
    loss2 = jax.block_until_ready(
        simple_contrastive_loss(emb2, temperature=TEMPERATURE, tile_m=8, tile_n=16))
    ref2 = jax.block_until_ready(_reference_loss(emb2, TEMPERATURE))
    assert jnp.allclose(loss2, ref2, rtol=1e-3, atol=1e-3), (loss2, ref2)

    print("KERNEL_OK")
</pallas_src>

<mosaic_0001>
module attributes {stable_mosaic.version = 11 : i64} {
  func.func @_contrastive_kernel(%arg0: i32, %arg1: i32, %arg2: memref<8x32xf32, #tpu.memory_space<vmem>>, %arg3: memref<8x32xf32, #tpu.memory_space<vmem>>, %arg4: memref<8x1xf32, #tpu.memory_space<vmem>>, %arg5: memref<8x1xf32, #tpu.memory_space<vmem>>, %arg6: memref<8x1xf32, #tpu.memory_space<vmem>>, %arg7: memref<8x1xf32, #tpu.memory_space<vmem>>) attributes {dimension_semantics = [#tpu.dimension_semantics<parallel>, #tpu.dimension_semantics<arbitrary>], iteration_bounds = array<i64: 2, 2>, scalar_prefetch = 0 : i64, scratch_operands = 3 : i64, tpu.core_type = #tpu.core_type<tc>, window_params = [{transform_indices = @transform_0, window_bounds = array<i64: 8, 32>}, {transform_indices = @transform_1, window_bounds = array<i64: 8, 32>}, {transform_indices = @transform_2, window_bounds = array<i64: 8, 1>}]} {
    %c0_i32 = arith.constant 0 : i32
    %0 = arith.cmpi eq, %arg1, %c0_i32 : i32
    %1 = arith.extui %0 : i1 to i32
    %c0_i32_0 = arith.constant 0 : i32
    %2 = arith.cmpi ne, %1, %c0_i32_0 : i32
    scf.if %2 {
      %cst_12 = arith.constant -1.000000e+30 : f32
      %23 = vector.broadcast %cst_12 : f32 to vector<8x1xf32>
      %c0_13 = arith.constant 0 : index
      %c0_14 = arith.constant 0 : index
      %24 = vector.load %arg5[%c0_13, %c0_14] : memref<8x1xf32, #tpu.memory_space<vmem>>, vector<8x1xf32>
      tpu.vector_store %arg5[%c0_13, %c0_14], %23 {strides = array<i32>} : memref<8x1xf32, #tpu.memory_space<vmem>>, vector<8x1xf32>,
      %cst_15 = arith.constant 0.000000e+00 : f32
      %25 = vector.broadcast %cst_15 : f32 to vector<8x1xf32>
      %c0_16 = arith.constant 0 : index
      %c0_17 = arith.constant 0 : index
      %26 = vector.load %arg6[%c0_16, %c0_17] : memref<8x1xf32, #tpu.memory_space<vmem>>, vector<8x1xf32>
      tpu.vector_store %arg6[%c0_16, %c0_17], %25 {strides = array<i32>} : memref<8x1xf32, #tpu.memory_space<vmem>>, vector<8x1xf32>,
      %cst_18 = arith.constant 0.000000e+00 : f32
      %27 = vector.broadcast %cst_18 : f32 to vector<8x1xf32>
      %c0_19 = arith.constant 0 : index
      %c0_20 = arith.constant 0 : index
      %28 = vector.load %arg7[%c0_19, %c0_20] : memref<8x1xf32, #tpu.memory_space<vmem>>, vector<8x1xf32>
      tpu.vector_store %arg7[%c0_19, %c0_20], %27 {strides = array<i32>} : memref<8x1xf32, #tpu.memory_space<vmem>>, vector<8x1xf32>,
    } else {
    }
    %c0 = arith.constant 0 : index
    %c0_1 = arith.constant 0 : index
    %3 = vector.load %arg2[%c0, %c0_1] : memref<8x32xf32, #tpu.memory_space<vmem>>, vector<8x32xf32>
    %c0_2 = arith.constant 0 : index
    %c0_3 = arith.constant 0 : index
    %4 = vector.load %arg3[%c0_2, %c0_3] : memref<8x32xf32, #tpu.memory_space<vmem>>, vector<8x32xf32>
    %cst = arith.constant dense<0.000000e+00> : vector<8x8xf32>
    %5 = tpu.matmul %3, %4, %cst {dimension_numbers = #tpu.dot_dimension_numbers<[1], [1], [0], [0], [0, 0, 1, 0], [], []>} : vector<8x32xf32>, vector<8x32xf32>, vector<8x8xf32> -> vector<8x8xf32>
    %c8_i32 = arith.constant 8 : i32
    %6 = arith.muli %arg1, %c8_i32 : i32
    %c1_i32 = arith.constant 1 : i32
    %7 = arith.addi %arg0, %c1_i32 : i32
    %c8_i32_4 = arith.constant 8 : i32
    %8 = arith.muli %7, %c8_i32_4 : i32
    %9 = arith.cmpi slt, %6, %8 : i32
    %c1_i32_5 = arith.constant 1 : i32
    %10 = arith.addi %arg1, %c1_i32_5 : i32
    %c8_i32_6 = arith.constant 8 : i32
    %11 = arith.muli %10, %c8_i32_6 : i32
    %c8_i32_7 = arith.constant 8 : i32
    %12 = arith.muli %arg0, %c8_i32_7 : i32
    %13 = arith.cmpi sgt, %11, %12 : i32
    %14 = arith.andi %9, %13 : i1
    %15 = arith.extui %14 : i1 to i32
    %c0_i32_8 = arith.constant 0 : i32
    %16 = arith.cmpi ne, %15, %c0_i32_8 : i32
    scf.if %16 {
      %c8_i32_12 = arith.constant 8 : i32
      %23 = arith.muli %arg0, %c8_i32_12 : i32
      %24 = tpu.iota {dimensions = array<i32: 0>} : vector<8x8xi32>
      %25 = vector.broadcast %23 : i32 to vector<8x8xi32>
      %26 = arith.addi %25, %24 : vector<8x8xi32>
      %c8_i32_13 = arith.constant 8 : i32
      %27 = arith.muli %arg1, %c8_i32_13 : i32
      %28 = tpu.iota {dimensions = array<i32: 1>} : vector<8x8xi32>
      %29 = vector.broadcast %27 : i32 to vector<8x8xi32>
      %30 = arith.addi %29, %28 : vector<8x8xi32>
      %31 = arith.cmpi eq, %26, %30 : vector<8x8xi32>
      %c0_14 = arith.constant 0 : index
      %c0_15 = arith.constant 0 : index
      %32 = vector.load %arg7[%c0_14, %c0_15] : memref<8x1xf32, #tpu.memory_space<vmem>>, vector<8x1xf32>
      %cst_16 = arith.constant 0.000000e+00 : f32
      %33 = vector.broadcast %cst_16 : f32 to vector<8x8xf32>
      %34 = arith.select %31, %5, %33 : vector<8x8xi1>, vector<8x8xf32>
      %cst_17 = arith.constant dense<0.000000e+00> : vector<8xf32>
      %35 = vector.multi_reduction <add>, %34, %cst_17 [1] : vector<8x8xf32> to vector<8xf32>
      %36 = vector.shape_cast %35 : vector<8xf32> to vector<8x1xf32>
      %37 = arith.addf %32, %36 : vector<8x1xf32>
      %c0_18 = arith.constant 0 : index
      %c0_19 = arith.constant 0 : index
      %38 = vector.load %arg7[%c0_18, %c0_19] : memref<8x1xf32, #tpu.memory_space<vmem>>, vector<8x1xf32>
      tpu.vector_store %arg7[%c0_18, %c0_19], %37 {strides = array<i32>} : memref<8x1xf32, #tpu.memory_space<vmem>>, vector<8x1xf32>,
      %cst_20 = arith.constant -1.000000e+30 : f32
      %39 = vector.broadcast %cst_20 : f32 to vector<8x8xf32>
      %40 = arith.select %31, %39, %5 : vector<8x8xi1>, vector<8x8xf32>
      %c0_21 = arith.constant 0 : index
      %c0_22 = arith.constant 0 : index
      %41 = vector.load %arg5[%c0_21, %c0_22] : memref<8x1xf32, #tpu.memory_space<vmem>>, vector<8x1xf32>
      %cst_23 = arith.constant dense<0xFF800000> : vector<8xf32>
      %42 = vector.multi_reduction <maximumf>, %40, %cst_23 [1] : vector<8x8xf32> to vector<8xf32>
      %43 = vector.shape_cast %42 : vector<8xf32> to vector<8x1xf32>
      %44 = arith.maximumf %41, %43 : vector<8x1xf32>
      %45 = arith.subf %41, %44 : vector<8x1xf32>
      %46 = math.exp %45 : vector<8x1xf32>
      %c0_24 = arith.constant 0 : index
      %c0_25 = arith.constant 0 : index
      %47 = vector.load %arg6[%c0_24, %c0_25] : memref<8x1xf32, #tpu.memory_space<vmem>>, vector<8x1xf32>
      %48 = arith.mulf %46, %47 : vector<8x1xf32>
      %49 = vector.broadcast %44 : vector<8x1xf32> to vector<8x8xf32>
      %50 = arith.subf %40, %49 : vector<8x8xf32>
      %51 = math.exp %50 : vector<8x8xf32>
      %cst_26 = arith.constant dense<0.000000e+00> : vector<8xf32>
      %52 = vector.multi_reduction <add>, %51, %cst_26 [1] : vector<8x8xf32> to vector<8xf32>
      %53 = vector.shape_cast %52 : vector<8xf32> to vector<8x1xf32>
      %54 = arith.addf %48, %53 : vector<8x1xf32>
      %c0_27 = arith.constant 0 : index
      %c0_28 = arith.constant 0 : index
      %55 = vector.load %arg6[%c0_27, %c0_28] : memref<8x1xf32, #tpu.memory_space<vmem>>, vector<8x1xf32>
      tpu.vector_store %arg6[%c0_27, %c0_28], %54 {strides = array<i32>} : memref<8x1xf32, #tpu.memory_space<vmem>>, vector<8x1xf32>,
      %c0_29 = arith.constant 0 : index
      %c0_30 = arith.constant 0 : index
      %56 = vector.load %arg5[%c0_29, %c0_30] : memref<8x1xf32, #tpu.memory_space<vmem>>, vector<8x1xf32>
      tpu.vector_store %arg5[%c0_29, %c0_30], %44 {strides = array<i32>} : memref<8x1xf32, #tpu.memory_space<vmem>>, vector<8x1xf32>,
    } else {
    }
    %true = arith.constant true
    %17 = arith.xori %14, %true : i1
    %18 = arith.extui %17 : i1 to i32
    %c0_i32_9 = arith.constant 0 : i32
    %19 = arith.cmpi ne, %18, %c0_i32_9 : i32
    scf.if %19 {
      %c0_12 = arith.constant 0 : index
      %c0_13 = arith.constant 0 : index
      %23 = vector.load %arg5[%c0_12, %c0_13] : memref<8x1xf32, #tpu.memory_space<vmem>>, vector<8x1xf32>
      %cst_14 = arith.constant dense<0xFF800000> : vector<8xf32>
      %24 = vector.multi_reduction <maximumf>, %5, %cst_14 [1] : vector<8x8xf32> to vector<8xf32>
      %25 = vector.shape_cast %24 : vector<8xf32> to vector<8x1xf32>
      %26 = arith.maximumf %23, %25 : vector<8x1xf32>
      %27 = arith.subf %23, %26 : vector<8x1xf32>
      %28 = math.exp %27 : vector<8x1xf32>
      %c0_15 = arith.constant 0 : index
      %c0_16 = arith.constant 0 : index
      %29 = vector.load %arg6[%c0_15, %c0_16] : memref<8x1xf32, #tpu.memory_space<vmem>>, vector<8x1xf32>
      %30 = arith.mulf %28, %29 : vector<8x1xf32>
      %31 = vector.broadcast %26 : vector<8x1xf32> to vector<8x8xf32>
      %32 = arith.subf %5, %31 : vector<8x8xf32>
      %33 = math.exp %32 : vector<8x8xf32>
      %cst_17 = arith.constant dense<0.000000e+00> : vector<8xf32>
      %34 = vector.multi_reduction <add>, %33, %cst_17 [1] : vector<8x8xf32> to vector<8xf32>
      %35 = vector.shape_cast %34 : vector<8xf32> to vector<8x1xf32>
      %36 = arith.addf %30, %35 : vector<8x1xf32>
      %c0_18 = arith.constant 0 : index
      %c0_19 = arith.constant 0 : index
      %37 = vector.load %arg6[%c0_18, %c0_19] : memref<8x1xf32, #tpu.memory_space<vmem>>, vector<8x1xf32>
      tpu.vector_store %arg6[%c0_18, %c0_19], %36 {strides = array<i32>} : memref<8x1xf32, #tpu.memory_space<vmem>>, vector<8x1xf32>,
      %c0_20 = arith.constant 0 : index
      %c0_21 = arith.constant 0 : index
      %38 = vector.load %arg5[%c0_20, %c0_21] : memref<8x1xf32, #tpu.memory_space<vmem>>, vector<8x1xf32>
      tpu.vector_store %arg5[%c0_20, %c0_21], %26 {strides = array<i32>} : memref<8x1xf32, #tpu.memory_space<vmem>>, vector<8x1xf32>,
    } else {
    }
    %c1_i32_10 = arith.constant 1 : i32
    %20 = arith.cmpi eq, %arg1, %c1_i32_10 : i32
    %21 = arith.extui %20 : i1 to i32
    %c0_i32_11 = arith.constant 0 : i32
    %22 = arith.cmpi ne, %21, %c0_i32_11 : i32
    scf.if %22 {
      %c0_12 = arith.constant 0 : index
      %c0_13 = arith.constant 0 : index
      %23 = vector.load %arg5[%c0_12, %c0_13] : memref<8x1xf32, #tpu.memory_space<vmem>>, vector<8x1xf32>
      %c0_14 = arith.constant 0 : index
      %c0_15 = arith.constant 0 : index
      %24 = vector.load %arg6[%c0_14, %c0_15] : memref<8x1xf32, #tpu.memory_space<vmem>>, vector<8x1xf32>
      %25 = math.log %24 : vector<8x1xf32>
      %26 = arith.addf %23, %25 : vector<8x1xf32>
      %c0_16 = arith.constant 0 : index
      %c0_17 = arith.constant 0 : index
      %27 = vector.load %arg7[%c0_16, %c0_17] : memref<8x1xf32, #tpu.memory_space<vmem>>, vector<8x1xf32>
      %28 = arith.subf %26, %27 : vector<8x1xf32>
      %29 = math.absf %28 : vector<8x1xf32>
      %c0_18 = arith.constant 0 : index
      %c0_19 = arith.constant 0 : index
      %30 = vector.load %arg4[%c0_18, %c0_19] : memref<8x1xf32, #tpu.memory_space<vmem>>, vector<8x1xf32>
      tpu.vector_store %arg4[%c0_18, %c0_19], %29 {strides = array<i32>} : memref<8x1xf32, #tpu.memory_space<vmem>>, vector<8x1xf32>,
    } else {
    }
    return
  }
  func.func @transform_0(%arg0: i32, %arg1: i32) -> (i32, i32) {
    %c0_i32 = arith.constant 0 : i32
    %c0_i32_0 = arith.constant 0 : i32
    return %arg0, %c0_i32 : i32, i32
  }
  func.func @transform_1(%arg0: i32, %arg1: i32) -> (i32, i32) {
    %c0_i32 = arith.constant 0 : i32
    %c0_i32_0 = arith.constant 0 : i32
    return %arg1, %c0_i32 : i32, i32
  }
  func.func @transform_2(%arg0: i32, %arg1: i32) -> (i32, i32) {
    %c0_i32 = arith.constant 0 : i32
    %c0_i32_0 = arith.constant 0 : i32
    return %arg0, %c0_i32 : i32, i32
  }
}

</mosaic_0001>

<bundles_post_ra>
// kernel: tpu_custom_call.1
= control target key start
LH: loop header
LB: loop body
LE: loop exit
PB: predicated region body
PF: predicated region fallthrough
CT: control target
= control target key end

     0   :  { %s1060_s0 = inlined_call_operand.hbm [shape: f32[16,32], index: 0, kind: input, shape index: {}]   ;;  %s1061_s1 = inlined_call_operand.hbm [shape: f32[16,32], index: 1, kind: input, shape index: {}]   ;;  %s1062_s2 = inlined_call_operand.vmem [shape: f32[16,1], index: 2, kind: output, shape index: {}]  }
   0x1   :  { %1064 = sst [smem:[#allocation11_spill]] %s1060_s0 }
   0x2   :  { %7 = vsyncpa [#allocation6], 0 }
   0x3   :  { %9 = vsyncpa [#allocation6 + $0x1], 0 }
   0x4   :  { %10 = vsyncpa [#allocation8], 0 }
   0x5   :  { %12 = vsyncpa [#allocation8 + $0x1], 0  ;;  %s818_s9 = smov 0   ;;  %s820_s10 = smov 0  }
   0x6   :  { %s822_s11 = smov 0   ;;  %s824_s12 = smov 0  }
   0x7   :  { %s826_s13 = smov 0   ;;  %s828_s14 = smov 0  }
   0x8   :  { %s830_s15 = smov 0   ;;  %s832_s16 = smov 0  }
   0x9   :  { %s834_s17 = smov 0   ;;  %s836_s18 = smov 0  }
   0xa   :  { %s838_s19 = smov 0  }
   0xb LB: > { %s492_s20 = sadd.s32 4294967295, %s793_s19   ;;  %s30_s21 = sadd.s32 1, %s789_s18  ;;  %s793_s19 = sphi %s838_s19, %s18_s19   ;;  %s789_s18 = sphi %s836_s18, %s1085_s18   ;;  %s785_s17 = sphi %s834_s17, %s1084_s17   ;;  %s781_s16 = sphi %s832_s16, %s1083_s16   ;;  %s777_s15 = sphi %s830_s15, %s1082_s15   ;;  %s773_s14 = sphi %s828_s14, %s1081_s14   ;;  %s769_s13 = sphi %s826_s13, %s1080_s13   ;;  %s765_s12 = sphi %s824_s12, %s1079_s12   ;;  %s761_s11 = sphi %s822_s11, %s1078_s11   ;;  %s757_s10 = sphi %s820_s10, %s1077_s10   ;;  %s753_s9 = sphi %s818_s9, %s1076_s9  }
   0xc   : > { %p44_p0 = scmp.ne.s32.totalorder %s773_s14, %s769_s13  ;;  %p45_p1 = scmp.eq.s32.totalorder %s793_s19, 0 }
   0xd   : > { %p50_p2 = scmp.ne.s32.totalorder %s769_s13, %s765_s12  ;;  %p877_p3 = scmp.eq.s32.totalorder %s492_s20, 0 }
   0xe   : > { %p46_p4 = por %p45_p1, %p44_p0  ;;  %p1063_p5 = scmp.lt.s32.totalorder %s793_s19, 4 }
   0xf   : > { %p886_p6 = por %p877_p3, %p50_p2  ;;  %s126_s24 = sand.u32 1, %s773_s14  }
  0x10   : > { %s496_s25 = sshll.u32 %s126_s24, 3  ;;  %s497_s26 = sshll.u32 %s789_s18, 7 }
  0x11   : > { %s1067_s0 = sld [smem:[#allocation11_spill]]  ;;  %s130_s30 = scalar_lea.vmem [#allocation5], %s496_s25 }
  0x12   : > { %s137_s3 = sshll.u32 %s130_s30, 4  ;;  %p897_p7 = pnand %p1063_p5, %p46_p4  ;;  %s138_s3 = int_to_ptr.vmem [resolvable:$true] %s137_s3 }
  0x13   : > { %p500_p8 = scmp.ge.s32.totalorder %s793_s19, 1  ;;  %p160_p9 = scmp.lt.s32.totalorder %s793_s19, 5 }
  0x14   : > { %s127_s5 = scalar_lea.sflag [#allocation6], %s126_s24  ;;  %p645_p10 = pneg %p897_p7 }
  0x15   : > { %s656_s6 = scalar_lea.vmem %s138_s3, 128  ;;  %s795_s7 = smov [#allocation5]  }
  0x16   : > { %p657_p11 = scmp.ne.s32.totalorder %s138_s3, %s656_s6  ;;  %s661_s8 = sshll.u32 %s795_s7, 4  ;;  %s662_s8 = int_to_ptr.vmem [resolvable:$false] %s661_s8 }
  0x17   : > { %s135_s29 = scalar_lea.hbm %s1067_s0, %s497_s26  ;;  %s663_s12 = scalar_lea.vmem %s662_s8, 256 }
  0x18   : > { %p659_p12 = pnand %p657_p11, %p645_p10  ;;  %p664_p0 = scmp.lt.s32.totalorder %s138_s3, %s662_s8 }
  0x19   : > { %p665_p2 = scmp.lt.s32.totalorder %s663_s12, %s656_s6 }
  0x1a   : > { %p660_p13 = pneg %p659_p12 }
  0x1b   : > { %p666_p4 = por %p665_p2, %p664_p0 }
  0x1d   : > { %p667_p5 = pnand %p666_p4, %p660_p13 }
  0x1f   : > { %670 = shalt.err (!%p667_p5)
}
  0x20   : > { %532 = dma.hbm_to_vmem [thread:$0]  (!%p897_p7), %s135_s29, 128, %s138_s3, %s127_s5  }
  0x21   : > { %p911_p5 = pnand %p500_p8, %p160_p9  ;;  %s37_s24 = sadd.s32 1, %s773_s14 }
  0x22   : > { %s27_s25 = sadd.s32 1, %s785_s17  ;;  %s63_s26 = sadd.s32 1, %s761_s11 }
  0x23   : > { %p28_p10 = scmp.ge.s32.totalorder %s27_s25, 2  ;;  %p70_p11 = scmp.ne.s32.totalorder %s761_s11, %s757_s10 }
  0x24   : > { %p76_p12 = scmp.ne.s32.totalorder %s757_s10, %s753_s9  ;;  %s144_s28 = sand.u32 1, %s761_s11  }
  0x25   : > { %s1087_s25 = smov (%p28_p10, %s27_s25), 0  ;;  %s1089_s21 = smov (!%p28_p10, %s30_s21), %s789_s18 }
  0x26   : > { %s60_s27 = ssub.s32 %s785_s17, %s1087_s25  ;;  %p32_p7 = scmp.ge.s32.totalorder %s1089_s21, 2 }
  0x27   : > { %p61_p8 = scmp.eq.s32.totalorder %s60_s27, 0  ;;  %p932_p9 = por %p70_p11, %p45_p1 }
  0x28   : > { %p938_p13 = por %p76_p12, %p877_p3  ;;  %s1091_s21 = smov (%p32_p7, %s1089_s21), 0 }
  0x29   : > { %s945_s30 = scalar_select %p61_p8, %s761_s11, %s63_s26  }
  0x2a   : > { %s34_s3 = ssub.s32 %s789_s18, %s1091_s21  ;;  %s498_s4 = sshll.u32 %s144_s28, 3 }
  0x2b   : > { %p35_p0 = scmp.eq.s32.totalorder %s34_s3, 0  ;;  %s499_s5 = sshll.u32 %s785_s17, 7 }
  0x2c   : > { %s148_s6 = scalar_lea.vmem [#allocation7], %s498_s4  ;;  %s153_s27 = scalar_lea.hbm %s1061_s1, %s499_s5 }
  0x2d   : > { %s155_s7 = sshll.u32 %s148_s6, 4  ;;  %p1072_p1 = scmp.lt.s32.totalorder %s793_s19, 4  ;;  %s156_s7 = int_to_ptr.vmem [resolvable:$true] %s155_s7 }
  0x2e   : > { %s951_s8 = scalar_select %p35_p0, %s773_s14, %s37_s24  }
  0x2f   : > { %p960_p3 = pnand %p1072_p1, %p932_p9  ;;  %s145_s26 = scalar_lea.sflag [#allocation8], %s144_s28 }
  0x30   : > { %s684_s3 = scalar_lea.vmem %s156_s7, 128  ;;  %s796_s24 = smov [#allocation7]  }
  0x31   : > { %p673_p2 = pneg %p960_p3  ;;  %p685_p4 = scmp.ne.s32.totalorder %s156_s7, %s684_s3 }
  0x32   : > { %s689_s4 = sshll.u32 %s796_s24, 4  ;;  %s690_s4 = int_to_ptr.vmem [resolvable:$false] %s689_s4 }
  0x33   : > { %p687_p10 = pnand %p685_p4, %p673_p2  ;;  %s691_s6 = scalar_lea.vmem %s690_s4, 256 }
  0x34   : > { %p692_p12 = scmp.lt.s32.totalorder %s156_s7, %s690_s4  ;;  %p693_p7 = scmp.lt.s32.totalorder %s691_s6, %s684_s3 }
  0x35   : > { %p688_p11 = pneg %p687_p10 }
  0x36   : > { %p694_p8 = por %p693_p7, %p692_p12 }
  0x38   : > { %p695_p0 = pnand %p694_p8, %p688_p11 }
  0x3a   : > { %698 = shalt.err (!%p695_p0)
}
  0x3b   : > { %535 = dma.hbm_to_vmem [thread:$0]  (!%p960_p3), %s153_s27, 128, %s156_s7, %s145_s26  }
  0x3c   : > { %164 = sbr.rel (%p911_p5) target bundleno = 1171 (0x493), region = 28  ;;  %s166_s28 = sand.u32 (!%p911_p5), 1, %s769_s13  }
  0x3d   : > { %s971_s29 = sshll.u32 (!%p911_p5), %s166_s28, 3  ;;  %s167_s5 = scalar_lea.sflag (!%p911_p5), [#allocation6], %s166_s28 }
  0x3e   : > { %s170_s12 = scalar_lea.vmem (!%p911_p5), [#allocation5], %s971_s29 }
  0x41   : > { %744 = dma.done.wait (%p886_p6), %s167_s5, 128  }
  0x42   : > { %746 = vsyncadd (%p886_p6), %s167_s5, 4294967168  ;;  %s175_s0 = sand.u32 1, %s757_s10  }
  0x43   : > { %s502_s7 = sshll.u32 %s175_s0, 3  ;;  %s176_s22 = scalar_lea.sflag [#allocation8], %s175_s0 }
  0x44   : > { %s179_s20 = scalar_lea.vmem [#allocation7], %s502_s7 }
  0x45   : > { %748 = dma.done.wait (%p938_p13), %s176_s22, 128  }
  0x46   : > { %750 = vsyncadd (%p938_p13), %s176_s22, 4294967168  ;;  %p204_p5 = scmp.lt.s32.totalorder %s781_s16, 1  ;;  %p504_p6 = scmp.ne.s32.totalorder %s777_s15, 0 }
  0x48   : > { %s205_s27 = scalar_select %p204_p5, %s781_s16, 1 }
  0x49   : > { %211 = sbr.rel (%p504_p6) target bundleno = 81 (0x51), region = 40 }
  0x4a   : > { %s503_s26 = sshll.u32 %s205_s27, 3 }
  0x4b   : > { %s988_s23 = scalar_lea.vmem %s1062_s2, %s503_s26 }
  0x4e   : > { %vm212_vm0 = vcmask 7168   ;;  %v797_v0 = vmov -1e+30   ;;  %v798_v1 = vmov 0.0  }
  0x4f   : > { %213 = vst.msk [vmem:[#allocation2] sm:$0xff] %vm212_vm0, %v797_v0  ;;  %214 = vst.msk [vmem:[#allocation3] sm:$0xff] %vm212_vm0, %v798_v1 }
  0x50   : > { %215 = vst.msk [vmem:[#allocation4] sm:$0xff] %vm212_vm0, %v798_v1 }
  0x51 PF: > { %v217_v2 = vld [vmem:[%s179_s20] sm:$0xff]  ;;  %vm218_vm1 = vcmask 261120   ;;  %v799_v3 = vmov 0.0   ;;  %vm800_vm2 = vmmov 0   ;;  %v216_v4 = vld [vmem:[%s170_s12] sm:$0xff]  ;;  %s507_s9 = sshll.u32 %s777_s15, 3 }
  0x52   : > { %520 = vmatprep.subr.mxu0 %v799_v3  ;;  %522 = vmatprep.mubr.msk.f32.mxu0 %vm800_vm2, %v799_v3  ;;  %s514_s4 = sshll.u32 %s781_s16, 3  ;;  %s517_s28 = sadd.s32 8, %s507_s9 }
  0x53   : > { %521 = vmatpush3.xpose.msk.msra.mxu0 %vm218_vm1, %v217_v2  ;;  %s515_s6 = sadd.s32 8, %s514_s4  ;;  %p997_p13 = scmp.gt.s32.totalorder %s517_s28, %s514_s4 }
  0x54   : > { %p993_p9 = scmp.lt.s32.totalorder %s507_s9, %s515_s6 }
  0x56   : > { %523 = vmatmul.mubr.msk.f32.vlgmr.msra.gmra.mxu0 %vm218_vm1, %v216_v4  ;;  %p303_p1 = pnand %p997_p13, %p993_p9 }
 0x114   : > { %306 = sbr.rel (%p303_p1) target bundleno = 714 (0x2ca), region = 44 }
 0x116   : > { %v291_v5 = vpop.f32.mrf.mxu0 }
 0x118   : > { %v524_v6 = vpop.f32.mrf.mxu0 }
 0x119   : > { %v307_v7 = vlaneseq  ;;  %v309_v8 = vstv %s514_s4  ;;  %v313_v9 = vstv %s507_s9  ;;  %vm318_vm3 = vcmask 64512   ;;  %v326_v17 = vld [vmem:[#allocation2] sm:$0xff]  ;;  %v316_v26 = vld [vmem:[#allocation4] sm:$0xff]  ;;  %v334_v33 = vld [vmem:[#allocation3] sm:$0xff] }
 0x11a   : > { %v801_v16 = vmov 0   ;;  %vm323_vm5 = vcmask 7168  }
 0x11b   : > { %v308_v10 = vshrl.u32 %v307_v7, 7  ;;  %v312_v11 = vand.u32 127, %v307_v7  ;;  %631 = vset.pattern.permute.xlu0 %v801_v16 }
 0x11d   : > { %v310_v12 = vadd.s32 %v309_v8, %v308_v10  ;;  %v314_v13 = vadd.s32 %v313_v9, %v312_v11 }
 0x11f   : > { %vm315_vm4 = vcmp.eq.s32.totalorder %v310_v12, %v314_v13 }
 0x120   : > { %v325_v14 = vsel %vm315_vm4, -1e+30, %v291_v5  ;;  %v317_v21 = vsel %vm315_vm4, %v291_v5, 0.0 }
 0x121   : > { %v327_v15 = vsel %vm318_vm3, %v325_v14, -inf  ;;  %v319_v22 = vsel %vm318_vm3, %v317_v21, 0.0 }
 0x122   : > { %328 = vmax.xlane.f32.xlu0 %v327_v15  ;;  %320 = vadd.xlane.f32.xlu1 %v319_v22 }
 0x1ab   : > { %v329_v18 = vpop.xlane.xlu0 %328  ;;  %v321_v27 = vpop.xlane.xlu1 %320 }
 0x1ac   : > { %v330_v19 = vmax.f32 %v326_v17, %v329_v18  ;;  %v322_v28 = vadd.f32 %v321_v27, %v316_v26 }
 0x1ae   : > { %v331_v20 = vsub.f32 %v326_v17, %v330_v19  ;;  %349 = vst.msk [vmem:[#allocation2] sm:$0xff] %vm323_vm5, %v330_v19  ;;  %338 = vperm.xlu0 %631, %v330_v19   ;;  %324 = vst.msk [vmem:[#allocation4] sm:$0xff] %vm323_vm5, %v322_v28 }
 0x1b0   : > { %v332_v31 = vmul.f32 1.442695, %v331_v20 }
 0x229   : > { %v339_v23 = vpop.permute.xlu0 %338 }
 0x22a   : > { %v341_v24 = vsub.f32 %v325_v14, %v339_v23 }
 0x22c   : > { %v342_v25 = vmul.f32 1.442695, %v341_v24 }
 0x22e   : > { %632 = vpow2.f32 %v342_v25 }
 0x22f   : > { %634 = vpow2.f32 %v332_v31 }
 0x23b   : > { %v633_v29 = vpop.eup %632 }
 0x23c   : > { %v344_v30 = vsel %vm318_vm3, %v633_v29, 0.0  ;;  %v635_v32 = vpop.eup %634 }
 0x23d   : > { %345 = vadd.xlane.f32.xlu1 %v344_v30  ;;  %v335_v34 = vmul.f32 %v635_v32, %v334_v33 }
 0x2c6   : > { %v346_v35 = vpop.xlane.xlu1 %345 }
 0x2c7   : > { %v347_v36 = vadd.f32 %v346_v35, %v335_v34 }
 0x2c9   : > { %348 = vst.msk [vmem:[#allocation3] sm:$0xff] %vm323_vm5, %v347_v36 }
 0x2ca PF: > { %352 = sbr.rel (!%p303_p1) target bundleno = 1140 (0x474), region = 48  ;;  %vm354_vm6 = vcmask (%p303_p1), 64512   ;;  %v802_v38 = vmov (%p303_p1), 0   ;;  %v353_v39 = vld [vmem:[#allocation2] sm:$0xff] (%p303_p1)  ;;  %vm376_vm7 = vcmask (%p303_p1), 7168  }
 0x2cb   : > { %v355_v37 = vsel (%p303_p1), %vm354_vm6, %v291_v5, -inf  ;;  %636 = vset.pattern.permute.xlu0 (%p303_p1), %v802_v38 }
 0x2cc   : > { %356 = vmax.xlane.f32.xlu0 (%p303_p1), %v355_v37 }
 0x2d0   : > { %v362_v50 = vld [vmem:[#allocation3] sm:$0xff] }
 0x355   : > { %v357_v40 = vpop.xlane.xlu0 %356 }
 0x356   : > { %v358_v41 = vmax.f32 %v353_v39, %v357_v40 }
 0x358   : > { %v359_v42 = vsub.f32 %v353_v39, %v358_v41  ;;  %378 = vst.msk [vmem:[#allocation2] sm:$0xff] %vm376_vm7, %v358_v41  ;;  %366 = vperm.xlu0 %636, %v358_v41  }
 0x35a   : > { %v360_v48 = vmul.f32 1.442695, %v359_v42 }
 0x3d3   : > { %v367_v43 = vpop.permute.xlu0 %366 }
 0x3d4   : > { %v369_v44 = vsub.f32 %v291_v5, %v367_v43 }
 0x3d6   : > { %v370_v45 = vmul.f32 1.442695, %v369_v44 }
 0x3d8   : > { %637 = vpow2.f32 %v370_v45 }
 0x3d9   : > { %639 = vpow2.f32 %v360_v48 }
 0x3e5   : > { %v638_v46 = vpop.eup %637 }
 0x3e6   : > { %v372_v47 = vsel %vm354_vm6, %v638_v46, 0.0  ;;  %v640_v49 = vpop.eup %639 }
 0x3e7   : > { %373 = vadd.xlane.f32.xlu1 %v372_v47  ;;  %v363_v51 = vmul.f32 %v640_v49, %v362_v50 }
 0x470   : > { %v374_v52 = vpop.xlane.xlu1 %373 }
 0x471   : > { %v375_v53 = vadd.f32 %v374_v52, %v363_v51 }
 0x473   : > { %377 = vst.msk [vmem:[#allocation3] sm:$0xff] %vm376_vm7, %v375_v53 }
 0x474 PF: > { %p511_p3 = scmp.ne.s32.totalorder %s777_s15, 1 }
 0x476   : > { %382 = sbr.rel (%p511_p3) target bundleno = 1171 (0x493), region = 52 }
 0x47b   : > { %v384_v54 = vld [vmem:[#allocation3] sm:$0xff]  ;;  %v383_v56 = vld [vmem:[#allocation2] sm:$0xff]  ;;  %v388_v58 = vld [vmem:[#allocation4] sm:$0xff]  ;;  %vm391_vm8 = vcmask 7168  }
 0x47c   : > { %641 = vlog2.f32 %v384_v54 }
 0x489   : > { %v642_v55 = vpop.eup %641 }
 0x48a   : > { %v386_v57 = vmul.f32 0.6931472, %v642_v55 }
 0x48c   : > { %v387_v59 = vadd.f32 %v386_v57, %v383_v56 }
 0x48e   : > { %v389_v60 = vsub.f32 %v387_v59, %v388_v58 }
 0x490   : > { %v390_v61 = vand.u32 2147483647, %v389_v60 }
 0x492   : > { %392 = vst.msk [vmem:[%s988_s23] sm:$0xff] %vm391_vm8, %v390_v61 }
 0x493 PF: > { %s18_s19 = sadd.s32 1, %s793_s19   ;;  %s1076_s9 = smov %s757_s10 }
 0x494   : > { %p15_p2 = scmp.ge.s32.totalorder %s18_s19, 6   ;;  %s1077_s10 = smov %s761_s11 }
 0x495   : > { %s1078_s11 = smov %s945_s30  ;;  %s1079_s12 = smov %s769_s13 }
 0x496   : > { %s1080_s13 = smov %s773_s14  ;;  %s1081_s14 = smov %s951_s8 }
 0x497   : > { %s1082_s15 = smov %s785_s17  ;;  %s1083_s16 = smov %s789_s18 }
 0x498   : > { %s1084_s17 = smov %s1087_s25  ;;  %s1085_s18 = smov %s1091_s21 }
 0x499   :  { %17 = sbr.rel (!%p15_p2) target bundleno = 11 (0xb), region = 97 }
 0x49e   :  { %412 = vsyncpa [#allocation6], 1 }
 0x49f   :  { %414 = vsyncpa [#allocation6 + $0x1], 1 }
 0x4a0   :  { %415 = vsyncpa [#allocation8], 1 }
 0x4a1   :  { %417 = vsyncpa [#allocation8 + $0x1], 1 }

</bundles_post_ra>
